<compile_context>
chip_gen: v7x
topology: tpu7x:2x2x1
jax: 0.10.0
libtpu: 0.0.40
codegen_flags: <defaults>
</compile_context>

<pallas_src>
import functools

import jax
import jax.numpy as jnp
from jax.experimental import pallas as pl
from jax.experimental.pallas import tpu as pltpu

FEAT_DIM = 512          # projection_head is hardcoded nn.Linear(512, hidden_mlp)
FCHUNK = 128            # feature-chunk width (lane-dense, 512/128 = 4 chunks)
HIDDEN_MLP = 128        # small stand-in for hidden_mlp (default 512)
OUTPUT_DIM = 16         # output_dim default
NMB_PROTOTYPES = 8      # nmb_prototypes default
HEAD_PAD = 128          # lane-dense width for head outputs
BATCH_PAD = 8           # pad head batch dim to one sublane
BN_EPS = 1e-5
L2_EPS = 1e-12


def _round_up(x, m):
    return (x + m - 1) // m * m


def _pad_channels(c):
    # Pad C to the bf16 sublane tile (16) so the in-kernel im2col stack is
    # tile-aligned.  Free for real ResNet channel counts (multiples of 16).
    return _round_up(max(c, 1), 16)


def _vmem_spec():
    # whole-array-resident spec -- only used for the tiny head tensors.
    return pl.BlockSpec(memory_space=pltpu.MemorySpace.VMEM)


# ---------------------------------------------------------------------------
# Backbone kernel: one (image, feature-chunk) grid step.
#   x_ref : (1, C_pad, FLAT_PAD)  bf16  -- zero-padded image, rows flattened to lanes
#   w_ref : (FCHUNK, 9*C_pad)     bf16  -- one 128-wide feature chunk of conv weights
#   o_ref : (1, 1, 1, FCHUNK)     f32   -- pooled feature chunk for this image
# ---------------------------------------------------------------------------
def backbone_kernel(x_ref, w_ref, o_ref, *, img_w, row_w, n_pos, hw):
    x = x_ref[0]                                              # (C_pad, FLAT_PAD)
    # In-kernel im2col (transposed): each 3x3 tap (dh, dw) is a static lane-slice
    # of the flattened padded image at offset dh*row_w + dw; stack the 9 taps
    # along sublanes -> (9*C_pad, n_pos).  Pieces are bf16-tile aligned (C_pad=16k).
    offsets = [dh * row_w + dw for dh in range(3) for dw in range(3)]
    col_t = jnp.concatenate([x[:, o:o + n_pos] for o in offsets], axis=0)
    # Single MXU matmul per feature chunk: (128, 9*C_pad) x (9*C_pad, H*(W+2)).
    conv = jnp.dot(w_ref[...], col_t, preferred_element_type=jnp.float32)
    act = jnp.maximum(conv, 0.0)                              # ReLU (f32, VPU)
    # Mask the 2 halo columns carried per flattened image row, then GAP.
    lane = jax.lax.broadcasted_iota(jnp.int32, (1, n_pos), 1)
    act = jnp.where((lane % row_w) < img_w, act, 0.0)
    feat = jnp.sum(act, axis=1) * (1.0 / hw)                  # (FCHUNK,)
    o_ref[...] = feat.reshape(1, 1, 1, FCHUNK)


def run_backbone(x_nchw, w_mat):
    N, C, H, W = x_nchw.shape
    c_pad = _pad_channels(C)
    assert w_mat.shape == (FEAT_DIM, 9 * c_pad)
    row_w = W + 2
    n_pos = H * row_w                       # output positions incl. 2 halo cols/row
    flat = (H + 2) * row_w
    flat_pad = _round_up(flat + row_w, 128)  # slack so all 9 tap-slices stay in bounds

    # Host prep: SAME zero-pad (spatial + channel), flatten rows to lanes, bf16.
    xp = jnp.pad(x_nchw, ((0, 0), (0, c_pad - C), (1, 1), (1, 1)))
    xf = jnp.pad(xp.reshape(N, c_pad, flat).astype(jnp.bfloat16),
                 ((0, 0), (0, 0), (0, flat_pad - flat)))

    n_chunks = FEAT_DIM // FCHUNK
    kernel = functools.partial(backbone_kernel, img_w=W, row_w=row_w,
                               n_pos=n_pos, hw=float(H * W))
    feats = pl.pallas_call(
        kernel,
        out_shape=jax.ShapeDtypeStruct((N, n_chunks, 1, FCHUNK), jnp.float32),
        grid=(N, n_chunks),
        in_specs=[
            pl.BlockSpec((1, c_pad, flat_pad), lambda n, j: (n, 0, 0)),
            pl.BlockSpec((FCHUNK, 9 * c_pad), lambda n, j: (j, 0)),
        ],
        out_specs=pl.BlockSpec((1, 1, 1, FCHUNK), lambda n, j: (n, j, 0, 0)),
        compiler_params=pltpu.CompilerParams(
            dimension_semantics=("parallel", "parallel")),
    )(xf, w_mat)
    return feats.reshape(N, FEAT_DIM)                   # == features(x).squeeze()


# ---------------------------------------------------------------------------
# Head kernel: projection_head (Linear -> BatchNorm1d(train) -> ReLU -> Linear),
# L2 normalize (dim=1), prototypes Linear (no bias).  Batch padded to 8 rows;
# BN statistics are masked to the real rows.  Outputs are lane-dense (N_pad, 128).
# ---------------------------------------------------------------------------
def head_kernel(f_ref, w1_ref, b1_ref, g_ref, beta_ref, w2_ref, b2_ref, wp_ref,
                z_ref, p_ref, *, n_real):
    f = f_ref[...]                                                  # (NP, 512) f32
    n_pad = f.shape[0]
    h = jnp.dot(f.astype(jnp.bfloat16), w1_ref[...],
                preferred_element_type=jnp.float32) + b1_ref[...]   # (NP, 128)

    # BatchNorm1d in training mode: batch stats over the REAL rows only,
    # biased variance, eps=1e-5.
    mask = (jax.lax.broadcasted_iota(jnp.int32, (n_pad, 1), 0)
            < n_real).astype(jnp.float32)
    inv_n = 1.0 / float(n_real)
    mean = jnp.sum(h * mask, axis=0, keepdims=True) * inv_n
    cent = (h - mean) * mask
    var = jnp.sum(cent * cent, axis=0, keepdims=True) * inv_n
    h = (h - mean) * jax.lax.rsqrt(var + BN_EPS) * g_ref[...] + beta_ref[...]
    h = jnp.maximum(h, 0.0)                                          # ReLU

    # Second Linear (columns >= OUTPUT_DIM are zero-padded -> z stays exact).
    # Tiny f32 matmuls kept as-is (review: negligible at (8,128)x(128,128)).
    z = jnp.dot(h, w2_ref[...], preferred_element_type=jnp.float32) + b2_ref[...]

    # F.normalize(x, dim=1, p=2): x / max(||x||_2, 1e-12)  (rsqrt on EUP)
    sumsq = jnp.sum(z * z, axis=1, keepdims=True)
    inv_norm = jax.lax.rsqrt(jnp.maximum(sumsq, L2_EPS * L2_EPS))
    z = z * inv_norm

    z_ref[...] = z
    p_ref[...] = jnp.dot(z, wp_ref[...], preferred_element_type=jnp.float32)


def run_head(feats, params):
    n = feats.shape[0]
    n_pad = max(BATCH_PAD, ((n + 7) // 8) * 8)
    f_pad = jnp.pad(feats, ((0, n_pad - n), (0, 0)))

    kernel = functools.partial(head_kernel, n_real=n)
    z_pad, p_pad = pl.pallas_call(
        kernel,
        out_shape=(
            jax.ShapeDtypeStruct((n_pad, HEAD_PAD), jnp.float32),
            jax.ShapeDtypeStruct((n_pad, HEAD_PAD), jnp.float32),
        ),
        in_specs=[_vmem_spec()] * 8,
        out_specs=(_vmem_spec(), _vmem_spec()),
    )(f_pad, params["w1"], params["b1"], params["gamma"], params["beta"],
      params["w2"], params["b2"], params["w_proto"])
    return z_pad[:n, :OUTPUT_DIM], p_pad[:n, :NMB_PROTOTYPES]


# ---------------------------------------------------------------------------
# Full CustomResNet.forward: multi-crop grouping by spatial size (static Python,
# mirroring unique_consecutive + cumsum), backbone per group, concat, head.
# ---------------------------------------------------------------------------
def custom_resnet_forward(inputs, params):
    if not isinstance(inputs, (list, tuple)):
        inputs = [inputs]
    sizes = [int(inp.shape[-1]) for inp in inputs]
    groups, start = [], 0
    for i in range(1, len(sizes) + 1):
        if i == len(sizes) or sizes[i] != sizes[start]:
            groups.append((start, i))
            start = i
    feats = []
    for s, e in groups:
        batch = jnp.concatenate(inputs[s:e], axis=0)
        feats.append(run_backbone(batch, params["w_conv"]))
    output = jnp.concatenate(feats, axis=0)
    return run_head(output, params)


# ---------------------------------------------------------------------------
# Deterministic parameter init (shapes implied by the module's __init__).
# ---------------------------------------------------------------------------
def init_params(key, c_in):
    k = jax.random.split(key, 6)
    c_pad = _pad_channels(c_in)
    # Conv2d kaiming_normal_(mode='fan_out', relu): std = sqrt(2 / (C_out*3*3)).
    # Layout (F, 9, C_pad) -> (F, 9*C_pad), matching the kernel's im2col row order
    # (tap-major, channel-minor); padded channel slots are zero.
    w_real = (jax.random.normal(k[0], (FEAT_DIM, 9, c_in), jnp.float32)
              * (2.0 / (FEAT_DIM * 9.0)) ** 0.5)
    w_mat = jnp.zeros((FEAT_DIM, 9, c_pad), jnp.float32).at[:, :, :c_in].set(w_real)
    w_mat = w_mat.reshape(FEAT_DIM, 9 * c_pad).astype(jnp.bfloat16)
    # nn.Linear default init: U(-1/sqrt(fan_in), 1/sqrt(fan_in))
    s1 = 1.0 / (FEAT_DIM ** 0.5)
    w1 = jax.random.uniform(k[1], (FEAT_DIM, HIDDEN_MLP), jnp.float32,
                            -s1, s1).astype(jnp.bfloat16)
    b1 = jax.random.uniform(k[2], (1, HIDDEN_MLP), jnp.float32, -s1, s1)
    gamma = jnp.ones((1, HIDDEN_MLP), jnp.float32)       # BatchNorm weight = 1
    beta = jnp.zeros((1, HIDDEN_MLP), jnp.float32)       # BatchNorm bias = 0
    s2 = 1.0 / (HIDDEN_MLP ** 0.5)
    w2 = jax.random.uniform(k[3], (HIDDEN_MLP, OUTPUT_DIM), jnp.float32, -s2, s2)
    b2 = jax.random.uniform(k[4], (1, OUTPUT_DIM), jnp.float32, -s2, s2)
    s3 = 1.0 / (OUTPUT_DIM ** 0.5)
    w_proto = jax.random.uniform(k[5], (OUTPUT_DIM, NMB_PROTOTYPES), jnp.float32,
                                 -s3, s3)
    # lane-dense zero padding for the head (exactness preserved: padded cols are 0)
    w2_p = jnp.zeros((HIDDEN_MLP, HEAD_PAD), jnp.float32).at[:, :OUTPUT_DIM].set(w2)
    b2_p = jnp.zeros((1, HEAD_PAD), jnp.float32).at[:, :OUTPUT_DIM].set(b2)
    wp_p = jnp.zeros((HEAD_PAD, HEAD_PAD), jnp.float32).at[
        :OUTPUT_DIM, :NMB_PROTOTYPES].set(w_proto)
    return dict(w_conv=w_mat, w1=w1, b1=b1, gamma=gamma, beta=beta,
                w2=w2_p, b2=b2_p, w_proto=wp_p)


if __name__ == "__main__":
    key = jax.random.PRNGKey(0)
    k_x, k_p = jax.random.split(key)
    N, C, H, W = 2, 4, 16, 16
    x = jax.random.normal(k_x, (N, C, H, W), jnp.float32)   # NCHW, like PyTorch
    params = init_params(k_p, C)

    z, protos = custom_resnet_forward(x, params)
    jax.block_until_ready((z, protos))

    assert z.shape == (N, OUTPUT_DIM)
    assert protos.shape == (N, NMB_PROTOTYPES)
    print("KERNEL_OK")
</pallas_src>

<mosaic_0001>
module attributes {stable_mosaic.version = 11 : i64} {
  func.func @backbone_kernel(%arg0: i32, %arg1: i32, %arg2: memref<1x16x384xbf16, #tpu.memory_space<vmem>>, %arg3: memref<128x144xbf16, #tpu.memory_space<vmem>>, %arg4: memref<1x1x1x128xf32, #tpu.memory_space<vmem>>) attributes {dimension_semantics = [#tpu.dimension_semantics<parallel>, #tpu.dimension_semantics<parallel>], iteration_bounds = array<i64: 2, 4>, scalar_prefetch = 0 : i64, scratch_operands = 0 : i64, tpu.core_type = #tpu.core_type<tc>, window_params = [{transform_indices = @transform_0, window_bounds = array<i64: 1, 16, 384>}, {transform_indices = @transform_1, window_bounds = array<i64: 128, 144>}, {transform_indices = @transform_2, window_bounds = array<i64: 1, 1, 1, 128>}]} {
    %c0 = arith.constant 0 : index
    %c0_0 = arith.constant 0 : index
    %c0_1 = arith.constant 0 : index
    %0 = vector.load %arg2[%c0, %c0_0, %c0_1] : memref<1x16x384xbf16, #tpu.memory_space<vmem>>, vector<1x16x384xbf16>
    %1 = vector.shape_cast %0 : vector<1x16x384xbf16> to vector<16x384xbf16>
    %2 = vector.extract_strided_slice %1 {offsets = [0, 0], sizes = [16, 288], strides = [1, 1]} : vector<16x384xbf16> to vector<16x288xbf16>
    %3 = vector.extract_strided_slice %1 {offsets = [0, 1], sizes = [16, 288], strides = [1, 1]} : vector<16x384xbf16> to vector<16x288xbf16>
    %4 = vector.extract_strided_slice %1 {offsets = [0, 2], sizes = [16, 288], strides = [1, 1]} : vector<16x384xbf16> to vector<16x288xbf16>
    %5 = vector.extract_strided_slice %1 {offsets = [0, 18], sizes = [16, 288], strides = [1, 1]} : vector<16x384xbf16> to vector<16x288xbf16>
    %6 = vector.extract_strided_slice %1 {offsets = [0, 19], sizes = [16, 288], strides = [1, 1]} : vector<16x384xbf16> to vector<16x288xbf16>
    %7 = vector.extract_strided_slice %1 {offsets = [0, 20], sizes = [16, 288], strides = [1, 1]} : vector<16x384xbf16> to vector<16x288xbf16>
    %8 = vector.extract_strided_slice %1 {offsets = [0, 36], sizes = [16, 288], strides = [1, 1]} : vector<16x384xbf16> to vector<16x288xbf16>
    %9 = vector.extract_strided_slice %1 {offsets = [0, 37], sizes = [16, 288], strides = [1, 1]} : vector<16x384xbf16> to vector<16x288xbf16>
    %10 = vector.extract_strided_slice %1 {offsets = [0, 38], sizes = [16, 288], strides = [1, 1]} : vector<16x384xbf16> to vector<16x288xbf16>
    %11 = tpu.concatenate %2, %3, %4, %5, %6, %7, %8, %9, %10 in 0 : vector<16x288xbf16>, vector<16x288xbf16>, vector<16x288xbf16>, vector<16x288xbf16>, vector<16x288xbf16>, vector<16x288xbf16>, vector<16x288xbf16>, vector<16x288xbf16>, vector<16x288xbf16> -> vector<144x288xbf16>
    %c0_2 = arith.constant 0 : index
    %c0_3 = arith.constant 0 : index
    %12 = vector.load %arg3[%c0_2, %c0_3] : memref<128x144xbf16, #tpu.memory_space<vmem>>, vector<128x144xbf16>
    %cst = arith.constant dense<0.000000e+00> : vector<128x288xf32>
    %13 = tpu.matmul %12, %11, %cst {dimension_numbers = #tpu.dot_dimension_numbers<[1], [0], [0], [1], [0, 0, 1, 1], [], []>} : vector<128x144xbf16>, vector<144x288xbf16>, vector<128x288xf32> -> vector<128x288xf32>
    %cst_4 = arith.constant 0.000000e+00 : f32
    %14 = vector.broadcast %cst_4 : f32 to vector<128x288xf32>
    %15 = arith.maximumf %13, %14 : vector<128x288xf32>
    %16 = tpu.iota {dimensions = array<i32: 1>} : vector<1x288xi32>
    %c18_i32 = arith.constant 18 : i32
    %c0_i32 = arith.constant 0 : i32
    %17 = arith.cmpi eq, %c18_i32, %c0_i32 : i32
    %c1_i32 = arith.constant 1 : i32
    %18 = arith.select %17, %c1_i32, %c18_i32 : i32
    %19 = vector.broadcast %18 : i32 to vector<1x288xi32>
    %20 = arith.remsi %16, %19 : vector<1x288xi32>
    %c0_i32_5 = arith.constant 0 : i32
    %21 = vector.broadcast %c0_i32_5 : i32 to vector<1x288xi32>
    %22 = arith.cmpi ne, %20, %21 : vector<1x288xi32>
    %c0_i32_6 = arith.constant 0 : i32
    %23 = vector.broadcast %c0_i32_6 : i32 to vector<1x288xi32>
    %24 = arith.cmpi slt, %20, %23 : vector<1x288xi32>
    %c0_i32_7 = arith.constant 0 : i32
    %25 = arith.cmpi slt, %18, %c0_i32_7 : i32
    %26 = vector.broadcast %25 : i1 to vector<1x288xi1>
    %27 = vector.broadcast %26 : vector<1x288xi1> to vector<1x288xi1>
    %28 = arith.xori %24, %27 : vector<1x288xi1>
    %29 = arith.andi %28, %22 : vector<1x288xi1>
    %30 = vector.broadcast %18 : i32 to vector<1x288xi32>
    %31 = arith.addi %20, %30 : vector<1x288xi32>
    %32 = arith.select %29, %31, %20 : vector<1x288xi1>, vector<1x288xi32>
    %c16_i32 = arith.constant 16 : i32
    %33 = vector.broadcast %c16_i32 : i32 to vector<1x288xi32>
    %34 = arith.cmpi slt, %32, %33 : vector<1x288xi32>
    %cst_8 = arith.constant 0.000000e+00 : f32
    %35 = vector.shape_cast %34 : vector<1x288xi1> to vector<1x288xi1>
    %36 = vector.broadcast %35 : vector<1x288xi1> to vector<128x288xi1>
    %37 = vector.broadcast %cst_8 : f32 to vector<128x288xf32>
    %38 = arith.select %36, %15, %37 : vector<128x288xi1>, vector<128x288xf32>
    %cst_9 = arith.constant dense<0.000000e+00> : vector<128xf32>
    %39 = vector.multi_reduction <add>, %38, %cst_9 [1] : vector<128x288xf32> to vector<128xf32>
    %cst_10 = arith.constant 3.906250e-03 : f32
    %40 = vector.broadcast %cst_10 : f32 to vector<128xf32>
    %41 = arith.mulf %39, %40 : vector<128xf32>
    %42 = vector.shape_cast %41 : vector<128xf32> to vector<1x1x1x128xf32>
    %c0_11 = arith.constant 0 : index
    %c0_12 = arith.constant 0 : index
    %c0_13 = arith.constant 0 : index
    %c0_14 = arith.constant 0 : index
    %43 = vector.load %arg4[%c0_11, %c0_12, %c0_13, %c0_14] : memref<1x1x1x128xf32, #tpu.memory_space<vmem>>, vector<1x1x1x128xf32>
    tpu.vector_store %arg4[%c0_11, %c0_12, %c0_13, %c0_14], %42 {strides = array<i32>} : memref<1x1x1x128xf32, #tpu.memory_space<vmem>>, vector<1x1x1x128xf32>,
    return
  }
  func.func @transform_0(%arg0: i32, %arg1: i32) -> (i32, i32, i32) {
    %c0_i32 = arith.constant 0 : i32
    %c0_i32_0 = arith.constant 0 : i32
    %c0_i32_1 = arith.constant 0 : i32
    return %arg0, %c0_i32, %c0_i32_0 : i32, i32, i32
  }
  func.func @transform_1(%arg0: i32, %arg1: i32) -> (i32, i32) {
    %c0_i32 = arith.constant 0 : i32
    %c0_i32_0 = arith.constant 0 : i32
    return %arg1, %c0_i32 : i32, i32
  }
  func.func @transform_2(%arg0: i32, %arg1: i32) -> (i32, i32, i32, i32) {
    %c0_i32 = arith.constant 0 : i32
    %c0_i32_0 = arith.constant 0 : i32
    %c0_i32_1 = arith.constant 0 : i32
    return %arg0, %arg1, %c0_i32, %c0_i32_0 : i32, i32, i32, i32
  }
}

</mosaic_0001>

<bundles_post_ra>
// kernel: tpu_custom_call.1
= control target key start
LH: loop header
LB: loop body
LE: loop exit
PB: predicated region body
PF: predicated region fallthrough
CT: control target
= control target key end

     0   :  { %7 = vsyncpa [#allocation3], 0  ;;  %s1745_s0 = inlined_call_operand.vmem [shape: bf16[2,16,384], index: 0, kind: input, shape index: {}]   ;;  %s1746_s1 = inlined_call_operand.vmem [shape: bf16[512,144], index: 1, kind: input, shape index: {}]   ;;  %s1747_s2 = inlined_call_operand.hbm [shape: f32[2,4,1,128], index: 2, kind: output, shape index: {}]  }
   0x1   :  { %9 = vsyncpa [#allocation3 + $0x1], 0  ;;  %s1381_s9 = smov 0   ;;  %s1383_s10 = smov 0  }
   0x2   :  { %s1385_s11 = smov 0   ;;  %s1387_s12 = smov 0  }
   0x3   :  { %s1389_s13 = smov 0   ;;  %s1391_s14 = smov 0  }
   0x4   :  { %s1393_s15 = smov 0   ;;  %s1395_s16 = smov 0  }
   0x5 LB: > { %s1096_s17 = sadd.s32 4294967295, %s1354_s16   ;;  %s1097_s18 = sadd.s32 4294967294, %s1354_s16   ;;  %s1354_s16 = sphi %s1395_s16, %s15_s16   ;;  %s1350_s15 = sphi %s1393_s15, %s1762_s15   ;;  %s1346_s14 = sphi %s1391_s14, %s1761_s14   ;;  %s1342_s13 = sphi %s1389_s13, %s1760_s13   ;;  %s1338_s12 = sphi %s1387_s12, %s1759_s12   ;;  %s1334_s11 = sphi %s1385_s11, %s1758_s11   ;;  %s1330_s10 = sphi %s1383_s10, %s1757_s10   ;;  %s1326_s9 = sphi %s1381_s9, %s1756_s9  }
   0x6   : > { %s24_s19 = sadd.s32 1, %s1346_s14  ;;  %s27_s20 = sadd.s32 1, %s1350_s15 }
   0x7   : > { %p25_p0 = scmp.ge.s32.totalorder %s24_s19, 4  ;;  %p98_p1 = scmp.ne.s32.totalorder %s1334_s11, %s1330_s10 }
   0x8   : > { %p99_p2 = scmp.eq.s32.totalorder %s1096_s17, 7  ;;  %p104_p5 = scmp.ne.s32.totalorder %s1330_s10, %s1326_s9 }
   0x9   : > { %s1764_s19 = smov (%p25_p0, %s24_s19), 0  ;;  %s1766_s20 = smov (!%p25_p0, %s27_s20), %s1350_s15 }
   0xa   : > { %s84_s21 = ssub.s32 %s1346_s14, %s1764_s19  ;;  %p1432_p3 = por %p99_p2, %p98_p1 }
   0xb   : > { %p29_p4 = scmp.ge.s32.totalorder %s1766_s20, 2  ;;  %p105_p6 = scmp.eq.s32.totalorder %s1097_s18, 7 }
   0xc   : > { %p1100_p7 = scmp.ge.s32.totalorder %s1354_s16, 1  ;;  %p141_p9 = scmp.lt.s32.totalorder %s1354_s16, 9 }
   0xd   : > { %s1768_s20 = smov (%p29_p4, %s1766_s20), 0  ;;  %p1441_p8 = por %p105_p6, %p104_p5 }
   0xe   : > { %s83_s24 = ssub.s32 %s1350_s15, %s1768_s20  ;;  %s88_s25 = sadd.s32 1, %s1334_s11 }
   0xf   : > { %s85_s26 = sor.u32 %s84_s21, %s83_s24  ;;  %p142_p10 = pnand %p1100_p7, %p141_p9 }
  0x10   : > { %p86_p11 = scmp.eq.s32.totalorder %s85_s26, 0  ;;  %p168_p12 = scmp.lt.s32.totalorder (!%p142_p10), %s1342_s13, 1  ;;  %v1356_v0 = vmov (!%p142_p10), 0   ;;  %vm385_vm0 = vcmask (!%p142_p10), 130048   ;;  %vm207_vm1 = vcmask (!%p142_p10), 1039360   ;;  %vm219_vm2 = vcmask (!%p142_p10), 1031168  }
  0x11   : > { %145 = sbr.rel (%p142_p10) target bundleno = 633 (0x279), region = 28  ;;  %523 = vmatprep.subr.bf16.mxu1 (!%p142_p10), %v1356_v0  ;;  %s1357_s5 = smov (!%p142_p10), 127   ;;  %vm231_vm3 = vcmask (!%p142_p10), 900096   ;;  %vm243_vm4 = vcmask (!%p142_p10), 891904   ;;  %vm255_vm5 = vcmask (!%p142_p10), 883712   ;;  %vm267_vm6 = vcmask (!%p142_p10), 752640  }
  0x12   : > { %s1450_s27 = scalar_select %p86_p11, %s1334_s11, %s88_s25  }
  0x13   : > { %s1358_s6 = smov (!%p142_p10), 126   ;;  %s1359_s7 = smov (!%p142_p10), 110   ;;  %vm279_vm7 = vcmask (!%p142_p10), 744448   ;;  %vm291_vm8 = vcmask (!%p142_p10), 736256   ;;  %v668_v60 = vlaneseq (!%p142_p10) }
  0x14   : > { %s1360_s8 = smov (!%p142_p10), 109   ;;  %s1361_s17 = smov (!%p142_p10), 108  }
  0x15   : > { %s1102_s18 = sshll.u32 (!%p142_p10), %s1338_s12, 4  ;;  %s1362_s21 = smov (!%p142_p10), 92   ;;  %v1505_v61 = vand.u32 (!%p142_p10), 127, %v668_v60 }
  0x16   : > { %p174_p13 = scmp.lt.s32.totalorder (!%p142_p10), %s1102_s18, 63  ;;  %s1364_s30 = smov (!%p142_p10), 90  }
  0x17   : > { %v671_v62 = vadd.s32 (!%p142_p10), 256, %v1505_v61  ;;  %v670_v63 = vadd.s32 (!%p142_p10), 128, %v1505_v61  ;;  %s166_s3 = sand.u32 (!%p142_p10), 1, %s1330_s10  }
  0x18   : > { %s169_s28 = scalar_select %p168_p12, %s1342_s13, 1 }
  0x19   : > { %s1770_s18 = smov (!%p174_p13, %s1102_s18), 63 }
  0x1a   : > { %s1145_s29 = smul.u32 24, %s169_s28  ;;  %s1144_s24 = sshll.u32 %s1770_s18, 3 }
  0x1b   : > { %s1463_s28 = scalar_lea.vmem %s1746_s1, %s1144_s24  ;;  %s1002_s18 = scalar_lea.sflag [#allocation3], %s166_s3 }
  0x1c   : > { %s172_s4 = scalar_lea.vmem %s1745_s0, %s1145_s29  ;;  %v1238_v4 = vld [vmem:[%s1463_s28 + $0x4] ss:$8 sps:$4 sm:$0xff]   ;;  %s1363_s29 = smov 91   ;;  %v1236_v42 = vld [vmem:[%s1463_s28] ss:$8 sps:$4 sm:$0xff]  }
  0x1d   : > { %v1232_v1 = vld [vmem:[%s172_s4 + $0x4] ss:$12 sps:$4 sm:$0xff]   ;;  %v1234_v2 = vld [vmem:[%s172_s4] ss:$12 sps:$4 sm:$0xff]   ;;  %v1235_v3 = vld [vmem:[%s172_s4 + $0x8] ss:$12 sps:$4 sm:$0xff]   ;;  %1132 = vmatprep.mubr.msk.bf16.mxu1 %vm385_vm0, %v1238_v4  ;;  %1124 = vmatprep.mubr.msk.bf16.mxu0 %vm385_vm0, %v1238_v4 }
  0x1e   : > { %203 = vrot.lane.b32.xlu0 %v1232_v1, %s1357_s5  ;;  %410 = vmatprep.subr.bf16.mxu0 %v1232_v1  ;;  %v1239_v45 = vld [vmem:[%s1463_s28 + $0x14] ss:$8 sps:$4 sm:$0xff]   ;;  %v1241_v47 = vld [vmem:[%s1463_s28 + $0x10] ss:$8 sps:$4 sm:$0xff]   ;;  %v1242_v48 = vld [vmem:[%s1463_s28 + $0x24] ss:$8 sps:$4 sm:$0xff]  }
  0x1f   : > { %201 = vrot.lane.b32.xlu1 %v1234_v2, %s1357_s5  ;;  %411 = vmatpush1.bf16.msra.mxu0 %v1234_v2  ;;  %v1244_v49 = vld [vmem:[%s1463_s28 + $0x20] ss:$8 sps:$4 sm:$0xff]   ;;  %v1245_v50 = vld [vmem:[%s1463_s28 + $0x34] ss:$8 sps:$4 sm:$0xff]   ;;  %v1247_v51 = vld [vmem:[%s1463_s28 + $0x30] ss:$8 sps:$4 sm:$0xff]  }
  0x20   : > { %524 = vmatpush1.bf16.msra.mxu1 %v1235_v3  ;;  %v1248_v52 = vld [vmem:[%s1463_s28 + $0x44] ss:$8 sps:$4 sm:$0xff]   ;;  %v1250_v53 = vld [vmem:[%s1463_s28 + $0x40] ss:$8 sps:$4 sm:$0xff]   ;;  %v1251_v54 = vld [vmem:[%s1463_s28 + $0x54] ss:$8 sps:$4 sm:$0xff]  }
  0x21   : > { %525 = vmatprep.subr.bf16.mxu1 %v1356_v0  ;;  %v1253_v55 = vld [vmem:[%s1463_s28 + $0x50] ss:$8 sps:$4 sm:$0xff]   ;;  %v1254_v56 = vld [vmem:[%s1463_s28 + $0x64] ss:$8 sps:$4 sm:$0xff]   ;;  %v1256_v57 = vld [vmem:[%s1463_s28 + $0x60] ss:$8 sps:$4 sm:$0xff]  }
  0x22   : > { %205 = vrot.lane.b32.xlu0 %v1235_v3, %s1357_s5  ;;  %v1257_v58 = vld [vmem:[%s1463_s28 + $0x74] ss:$8 sps:$4 sm:$0xff]   ;;  %v1259_v59 = vld [vmem:[%s1463_s28 + $0x70] ss:$8 sps:$4 sm:$0xff]   ;;  %s1140_s4 = sshll.u32 %s1342_s13, 2  ;;  %s1365_s24 = smov [#allocation2]  }
  0x23   : > { %215 = vrot.lane.b32.xlu1 %v1232_v1, %s1358_s6  ;;  %s1012_s5 = sadd.s32 %s1338_s12, %s1140_s4  ;;  %s1264_s25 = sshll.u32 %s1365_s24, 4  ;;  %s1265_s25 = int_to_ptr.vmem [resolvable:$false] %s1264_s25 }
  0x24   : > { %s1266_s26 = scalar_lea.vmem %s1265_s25, 32 }
  0x26   : > { %217 = vrot.lane.b32.xlu0 %v1235_v3, %s1358_s6 }
  0x27   : > { %213 = vrot.lane.b32.xlu1 %v1234_v2, %s1358_s6  ;;  %s1141_s6 = sshll.u32 %s1012_s5, 4 }
  0x28   : > { %s1692_s12 = scalar_lea.hbm %s1747_s2, %s1141_s6 }
  0x2a   : > { %227 = vrot.lane.b32.xlu0 %v1232_v1, %s1359_s7 }
  0x2b   : > { %229 = vrot.lane.b32.xlu1 %v1235_v3, %s1359_s7 }
  0x2e   : > { %225 = vrot.lane.b32.xlu0 %v1234_v2, %s1359_s7  ;;  %s167_s7 = scalar_lea.vmem [#allocation2], %s166_s3 }
  0x2f   : > { %239 = vrot.lane.b32.xlu1 %v1232_v1, %s1360_s8  ;;  %s1016_s13 = sshll.u32 %s167_s7, 4  ;;  %s1694_s13 = int_to_ptr.vmem [resolvable:$true] %s1016_s13 }
  0x30   : > { %p1267_p4 = scmp.lt.s32.totalorder %s1694_s13, %s1265_s25 }
  0x32   : > { %241 = vrot.lane.b32.xlu0 %v1235_v3, %s1360_s8 }
  0x33   : > { %237 = vrot.lane.b32.xlu1 %v1234_v2, %s1360_s8 }
  0x36   : > { %251 = vrot.lane.b32.xlu0 %v1232_v1, %s1361_s17 }
  0x37   : > { %253 = vrot.lane.b32.xlu1 %v1235_v3, %s1361_s17 }
  0x3a   : > { %249 = vrot.lane.b32.xlu0 %v1234_v2, %s1361_s17 }
  0x3b   : > { %263 = vrot.lane.b32.xlu1 %v1232_v1, %s1362_s21 }
  0x3e   : > { %265 = vrot.lane.b32.xlu0 %v1235_v3, %s1362_s21 }
  0x3f   : > { %261 = vrot.lane.b32.xlu1 %v1234_v2, %s1362_s21  ;;  %s1260_s21 = scalar_lea.vmem %s1694_s13, 16 }
  0x40   : > { %p1261_p0 = scmp.ne.s32.totalorder %s1694_s13, %s1260_s21  ;;  %p1268_p5 = scmp.lt.s32.totalorder %s1266_s26, %s1260_s21 }
  0x42   : > { %275 = vrot.lane.b32.xlu0 %v1232_v1, %s1363_s29  ;;  %p1262_p1 = pnand %p1261_p0, %p1432_p3  ;;  %p1269_p6 = por %p1268_p5, %p1267_p4 }
  0x43   : > { %277 = vrot.lane.b32.xlu1 %v1235_v3, %s1363_s29 }
  0x44   : > { %p1263_p2 = pneg %p1262_p1 }
  0x46   : > { %273 = vrot.lane.b32.xlu0 %v1234_v2, %s1363_s29  ;;  %p1270_p7 = pnand %p1269_p6, %p1263_p2 }
  0x47   : > { %287 = vrot.lane.b32.xlu1 %v1232_v1, %s1364_s30 }
  0x4a   : > { %289 = vrot.lane.b32.xlu0 %v1235_v3, %s1364_s30 }
  0x4b   : > { %285 = vrot.lane.b32.xlu1 %v1234_v2, %s1364_s30  ;;  %v1513_v2 = vmul.u32.u64.low 3817748708, %v1505_v61  ;;  %v1514_v3 = vmul.u32.u64.high 3817748708, %v1505_v61, %v1513_v2 }
  0x90   : > { %v204_v5 = vpop.permute.xlu0 %203 }
  0x91   : > { %v202_v6 = vpop.permute.xlu1 %201 }
  0x92   : > { %v208_v10 = vsel %vm207_vm1, %v202_v6, %v204_v5 }
  0x94   : > { %v206_v7 = vpop.permute.xlu0 %205 }
  0x95   : > { %v216_v8 = vpop.permute.xlu1 %215  ;;  %526 = vmatpush1.bf16.msra.mxu1 %v206_v7  ;;  %v209_v9 = vsel %vm207_vm1, %v204_v5, %v206_v7  ;;  %v1516_v4 = vmul.u32.u64.low 3817748708, %v670_v63  ;;  %v1517_v5 = vmul.u32.u64.high 3817748708, %v670_v63, %v1516_v4  ;;  %v678_v7 = vshrl.u32 %v1514_v3, 4 }
  0x96   : > { %412 = vmatprep.subr.bf16.mxu0 %v209_v9  ;;  %527 = vmatprep.subr.bf16.mxu1 %v1356_v0 }
  0x97   : > { %413 = vmatpush1.bf16.msra.mxu0 %v208_v10  ;;  %v679_v10 = vmul.u32 18, %v678_v7 }
  0x98   : > { %v218_v11 = vpop.permute.xlu0 %217 }
  0x99   : > { %v214_v12 = vpop.permute.xlu1 %213  ;;  %528 = vmatpush1.bf16.msra.mxu1 %v218_v11  ;;  %v221_v13 = vsel %vm219_vm2, %v216_v8, %v218_v11 }
  0x9a   : > { %414 = vmatprep.subr.bf16.mxu0 %v221_v13  ;;  %v220_v14 = vsel %vm219_vm2, %v214_v12, %v216_v8  ;;  %529 = vmatprep.subr.bf16.mxu1 %v1356_v0  ;;  %v689_v8 = vshrl.u32 %v1517_v5, 4  ;;  %v680_v13 = vsub.s32 %v1505_v61, %v679_v10 }
  0x9b   : > { %415 = vmatpush1.bf16.msra.mxu0 %v220_v14 }
  0x9c   : > { %v228_v15 = vpop.permute.xlu0 %227  ;;  %v690_v11 = vmul.u32 18, %v689_v8  ;;  %vm705_vm11 = vcmp.ne.s32.totalorder %v680_v13, 0  ;;  %vm708_vm12 = vcmp.lt.s32.totalorder %v680_v13, 0 }
  0x9d   : > { %v230_v16 = vpop.permute.xlu1 %229 }
  0x9e   : > { %v233_v17 = vsel %vm231_vm3, %v228_v15, %v230_v16  ;;  %530 = vmatpush1.bf16.msra.mxu1 %v230_v16  ;;  %v691_v14 = vsub.s32 %v670_v63, %v690_v11  ;;  %v714_v16 = vadd.s32 18, %v680_v13 }
  0x9f   : > { %416 = vmatprep.subr.bf16.mxu0 %v233_v17  ;;  %531 = vmatprep.subr.bf16.mxu1 %v1356_v0 }
  0xa0   : > { %v226_v18 = vpop.permute.xlu0 %225  ;;  %vm706_vm13 = vcmp.ne.s32.totalorder %v691_v14, 0  ;;  %vm709_vm14 = vcmp.lt.s32.totalorder %v691_v14, 0  ;;  %v715_v17 = vadd.s32 18, %v691_v14 }
  0xa1   : > { %v240_v19 = vpop.permute.xlu1 %239  ;;  %v232_v20 = vsel %vm231_vm3, %v226_v18, %v228_v15  ;;  %vm712_vm1 = vmand %vm709_vm14, %vm706_vm13  ;;  %vm948_vm13 = vcmask 589312   ;;  %vm955_vm14 = vcmask 654912  }
  0xa2   : > { %417 = vmatpush1.bf16.msra.mxu0 %v232_v20  ;;  %v718_v20 = vsel %vm712_vm1, %v715_v17, %v691_v14  ;;  %vm976_vm1 = vcmask 851712  }
  0xa4   : > { %v242_v21 = vpop.permute.xlu0 %241 }
  0xa5   : > { %v238_v22 = vpop.permute.xlu1 %237  ;;  %532 = vmatpush1.bf16.msra.mxu1 %v242_v21  ;;  %v245_v23 = vsel %vm243_vm4, %v240_v19, %v242_v21 }
  0xa6   : > { %418 = vmatprep.subr.bf16.mxu0 %v245_v23  ;;  %v244_v24 = vsel %vm243_vm4, %v238_v22, %v240_v19  ;;  %533 = vmatprep.subr.bf16.mxu1 %v1356_v0  ;;  %vm1531_vm4 = vcmp.lt.s32.totalorder %v718_v20, 16 }
  0xa7   : > { %419 = vmatpush1.bf16.msra.mxu0 %v244_v24 }
  0xa8   : > { %v252_v25 = vpop.permute.xlu0 %251 }
  0xa9   : > { %v254_v26 = vpop.permute.xlu1 %253 }
  0xaa   : > { %v257_v27 = vsel %vm255_vm5, %v252_v25, %v254_v26  ;;  %534 = vmatpush1.bf16.msra.mxu1 %v254_v26  ;;  %v901_v26 = vadd.s32 4294967280, %v1505_v61 }
  0xab   : > { %420 = vmatprep.subr.bf16.mxu0 %v257_v27  ;;  %535 = vmatprep.subr.bf16.mxu1 %v1356_v0  ;;  %v908_v27 = vadd.s32 4294967272, %v1505_v61 }
  0xac   : > { %v250_v28 = vpop.permute.xlu0 %249 }
  0xad   : > { %v264_v29 = vpop.permute.xlu1 %263  ;;  %v256_v30 = vsel %vm255_vm5, %v250_v28, %v252_v25  ;;  %vm778_vm5 = vcmask 261120  }
  0xae   : > { %421 = vmatpush1.bf16.msra.mxu0 %v256_v30 }
  0xb0   : > { %v266_v31 = vpop.permute.xlu0 %265 }
  0xb1   : > { %v262_v32 = vpop.permute.xlu1 %261  ;;  %536 = vmatpush1.bf16.msra.mxu1 %v266_v31  ;;  %v269_v33 = vsel %vm267_vm6, %v264_v29, %v266_v31 }
  0xb2   : > { %422 = vmatprep.subr.bf16.mxu0 %v269_v33  ;;  %v268_v34 = vsel %vm267_vm6, %v262_v32, %v264_v29  ;;  %537 = vmatprep.subr.bf16.mxu1 %v1356_v0  ;;  %vm899_vm6 = vcmask 130112  }
  0xb3   : > { %423 = vmatpush1.bf16.msra.mxu0 %v268_v34 }
  0xb4   : > { %v276_v35 = vpop.permute.xlu0 %275 }
  0xb5   : > { %v278_v36 = vpop.permute.xlu1 %277 }
  0xb6   : > { %v281_v37 = vsel %vm279_vm7, %v276_v35, %v278_v36  ;;  %538 = vmatpush1.bf16.msra.mxu1 %v278_v36 }
  0xb7   : > { %424 = vmatprep.subr.bf16.mxu0 %v281_v37  ;;  %539 = vmatprep.subr.bf16.mxu1 %v1356_v0  ;;  %v1509_v0 = vmul.u32.u64.low 3817748708, %v671_v62  ;;  %v1510_v1 = vmul.u32.u64.high 3817748708, %v671_v62, %v1509_v0 }
  0xb8   : > { %v274_v38 = vpop.permute.xlu0 %273 }
  0xb9   : > { %v288_v39 = vpop.permute.xlu1 %287  ;;  %v280_v40 = vsel %vm279_vm7, %v274_v38, %v276_v35  ;;  %v700_v6 = vshrl.u32 %v1510_v1, 4  ;;  %vm906_vm7 = vcmask 195712  }
  0xba   : > { %425 = vmatpush1.bf16.msra.mxu0 %v280_v40 }
  0xbb   : > { %v701_v9 = vmul.u32 18, %v700_v6 }
  0xbc   : > { %v290_v41 = vpop.permute.xlu0 %289 }
  0xbd   : > { %v286_v43 = vpop.permute.xlu1 %285  ;;  %540 = vmatpush1.bf16.msra.mxu1 %v290_v41  ;;  %v293_v44 = vsel %vm291_vm8, %v288_v39, %v290_v41  ;;  %v702_v12 = vsub.s32 %v671_v62, %v701_v9 }
  0xbe   : > { %426 = vmatprep.subr.bf16.mxu0 %v293_v44  ;;  %v292_v46 = vsel %vm291_vm8, %v286_v43, %v288_v39  ;;  %vm913_vm8 = vcmask 261312  }
  0xbf   : > { %427 = vmatpush1.bf16.msra.mxu0 %v292_v46  ;;  %vm707_vm9 = vcmp.ne.s32.totalorder %v702_v12, 0  ;;  %vm710_vm10 = vcmp.lt.s32.totalorder %v702_v12, 0  ;;  %v716_v15 = vadd.s32 18, %v702_v12 }
  0xc0   : > { %556 = vmatmul.mubr.bf16.vlgmr.msra.gmra.mrb[0].mxu1 %v1236_v42  ;;  %vm713_vm15 = vmand %vm710_vm10, %vm707_vm9  ;;  %vm920_vm9 = vcmask 326912   ;;  %vm927_vm10 = vcmask 392512  }
  0xc1   : > { %1133 = vmatprep.mubr.msk.bf16.mxu1 %vm385_vm0, %v1239_v45  ;;  %v719_v18 = vsel %vm713_vm15, %v716_v15, %v702_v12  ;;  %vm962_vm15 = vcmask 720512  }
  0xc2   : > { %443 = vmatmul.mubr.bf16.vlgmr.msra.gmra.mrb[0].mxu0 %v1236_v42  ;;  %vm1523_vm2 = vcmp.lt.s32.totalorder %v719_v18, 16 }
  0xc3   : > { %1125 = vmatprep.mubr.msk.bf16.mxu0 %vm385_vm0, %v1239_v45 }
  0xc8   : > { %564 = vmatmul.mubr.bf16.gmra.mrb[4].mxu1 %v1241_v47 }
  0xc9   : > { %1134 = vmatprep.mubr.msk.bf16.mxu1 %vm385_vm0, %v1242_v48 }
  0xca   : > { %453 = vmatmul.mubr.bf16.gmra.mrb[4].mxu0 %v1241_v47 }
  0xcb   : > { %1126 = vmatprep.mubr.msk.bf16.mxu0 %vm385_vm0, %v1242_v48 }
  0xd0   : > { %572 = vmatmul.mubr.bf16.gmra.mrb[8].mxu1 %v1244_v49 }
  0xd1   : > { %1135 = vmatprep.mubr.msk.bf16.mxu1 %vm385_vm0, %v1245_v50 }
  0xd2   : > { %463 = vmatmul.mubr.bf16.gmra.mrb[8].mxu0 %v1244_v49 }
  0xd3   : > { %1127 = vmatprep.mubr.msk.bf16.mxu0 %vm385_vm0, %v1245_v50 }
  0xd8   : > { %580 = vmatmul.mubr.bf16.gmra.mrb[12].mxu1 %v1247_v51 }
  0xd9   : > { %1136 = vmatprep.mubr.msk.bf16.mxu1 %vm385_vm0, %v1248_v52 }
  0xda   : > { %473 = vmatmul.mubr.bf16.gmra.mrb[12].mxu0 %v1247_v51 }
  0xdb   : > { %1128 = vmatprep.mubr.msk.bf16.mxu0 %vm385_vm0, %v1248_v52 }
  0xe0   : > { %588 = vmatmul.mubr.bf16.gmra.mrb[16].mxu1 %v1250_v53 }
  0xe1   : > { %1137 = vmatprep.mubr.msk.bf16.mxu1 %vm385_vm0, %v1251_v54 }
  0xe2   : > { %483 = vmatmul.mubr.bf16.gmra.mrb[16].mxu0 %v1250_v53 }
  0xe3   : > { %1129 = vmatprep.mubr.msk.bf16.mxu0 %vm385_vm0, %v1251_v54 }
  0xe8   : > { %596 = vmatmul.mubr.bf16.gmra.mrb[20].mxu1 %v1253_v55 }
  0xe9   : > { %1138 = vmatprep.mubr.msk.bf16.mxu1 %vm385_vm0, %v1254_v56 }
  0xea   : > { %493 = vmatmul.mubr.bf16.gmra.mrb[20].mxu0 %v1253_v55 }
  0xeb   : > { %1130 = vmatprep.mubr.msk.bf16.mxu0 %vm385_vm0, %v1254_v56 }
  0xf0   : > { %604 = vmatmul.mubr.bf16.gmra.mrb[24].mxu1 %v1256_v57 }
  0xf1   : > { %1139 = vmatprep.mubr.msk.bf16.mxu1 %vm385_vm0, %v1257_v58 }
  0xf2   : > { %503 = vmatmul.mubr.bf16.gmra.mrb[24].mxu0 %v1256_v57 }
  0xf3   : > { %1131 = vmatprep.mubr.msk.bf16.mxu0 %vm385_vm0, %v1257_v58  ;;  %vm711_vm0 = vmand %vm708_vm12, %vm705_vm11  ;;  %vm934_vm11 = vcmask 458112   ;;  %vm941_vm12 = vcmask 523712  }
  0xf4   : > { %v717_v19 = vsel %vm711_vm0, %v714_v16, %v680_v13  ;;  %vm969_vm0 = vcmask 786112  }
  0xf5   : > { %vm1527_vm3 = vcmp.lt.s32.totalorder %v717_v19, 16 }
  0xf8   : > { %612 = vmatmul.mubr.bf16.gmra.mrb[28].mxu1 %v1259_v59 }
  0xfa   : > { %513 = vmatmul.mubr.bf16.gmra.mrb[28].mxu0 %v1259_v59 }
 0x193   : > { %v557_v21 = vpop.f32.mrb[0].mxu1 }
 0x194   : > { %v622_v23 = vmax.f32 %v557_v21, 0.0  ;;  %v559_v24 = vpop.f32.mrb[1].mxu1 }
 0x195   : > { %v444_v25 = vpop.f32.mrb[0].mxu0  ;;  %v560_v28 = vpop.f32.mrb[2].mxu1 }
 0x196   : > { %v731_v29 = vsel %vm1523_vm2, %v622_v23, 0.0  ;;  %v620_v30 = vmax.f32 %v444_v25, 0.0  ;;  %v446_v31 = vpop.f32.mrb[1].mxu0  ;;  %v625_v32 = vmax.f32 %v560_v28, 0.0  ;;  %v562_v33 = vpop.f32.mrb[3].mxu1 }
 0x197   : > { %v621_v34 = vmax.f32 %v446_v31, 0.0  ;;  %v448_v35 = vpop.f32.mrb[2].mxu0  ;;  %v779_v41 = vsel %vm778_vm5, %v731_v29, 0.0 }
 0x198   : > { %v729_v36 = vsel %vm1527_vm3, %v620_v30, 0.0  ;;  %v623_v37 = vmax.f32 %v448_v35, 0.0  ;;  %v450_v38 = vpop.f32.mrb[3].mxu0  ;;  %v734_v42 = vsel %vm1523_vm2, %v625_v32, 0.0 }
 0x199   : > { %v730_v39 = vsel %vm1531_vm4, %v621_v34, 0.0  ;;  %v624_v40 = vmax.f32 %v450_v38, 0.0  ;;  %v784_v53 = vsel %vm778_vm5, %v734_v42, 0.0 }
 0x19a   : > { %v732_v43 = vsel %vm1527_vm3, %v623_v37, 0.0  ;;  %v777_v44 = vadd.f32 %v730_v39, %v729_v36 }
 0x19b   : > { %v733_v45 = vsel %vm1531_vm4, %v624_v40, 0.0  ;;  %v565_v46 = vpop.f32.mrb[4].mxu1 }
 0x19c   : > { %v628_v47 = vmax.f32 %v565_v46, 0.0  ;;  %v567_v48 = vpop.f32.mrb[5].mxu1  ;;  %v780_v49 = vadd.f32 %v779_v41, %v777_v44  ;;  %v783_v50 = vadd.f32 %v733_v45, %v732_v43 }
 0x19d   : > { %v454_v51 = vpop.f32.mrb[4].mxu0  ;;  %v568_v52 = vpop.f32.mrb[6].mxu1 }
 0x19e   : > { %v737_v54 = vsel %vm1523_vm2, %v628_v47, 0.0  ;;  %v626_v55 = vmax.f32 %v454_v51, 0.0  ;;  %v631_v56 = vmax.f32 %v568_v52, 0.0  ;;  %781 = vadd.xlane.f32.xlu0 %v780_v49  ;;  %v456_v57 = vpop.f32.mrb[5].mxu0  ;;  %v570_v58 = vpop.f32.mrb[7].mxu1  ;;  %v785_v59 = vadd.f32 %v784_v53, %v783_v50 }
 0x19f   : > { %v627_v62 = vmax.f32 %v456_v57, 0.0  ;;  %v458_v63 = vpop.f32.mrb[6].mxu0  ;;  %v789_v5 = vsel %vm778_vm5, %v737_v54, 0.0 }
 0x1a0   : > { %v735_v0 = vsel %vm1527_vm3, %v626_v55, 0.0  ;;  %v629_v1 = vmax.f32 %v458_v63, 0.0  ;;  %786 = vadd.xlane.f32.xlu1 %v785_v59  ;;  %v460_v2 = vpop.f32.mrb[7].mxu0  ;;  %v740_v6 = vsel %vm1523_vm2, %v631_v56, 0.0 }
 0x1a1   : > { %v736_v3 = vsel %vm1531_vm4, %v627_v62, 0.0  ;;  %v630_v4 = vmax.f32 %v460_v2, 0.0  ;;  %v794_v17 = vsel %vm778_vm5, %v740_v6, 0.0 }
 0x1a2   : > { %v738_v7 = vsel %vm1527_vm3, %v629_v1, 0.0  ;;  %v788_v8 = vadd.f32 %v736_v3, %v735_v0 }
 0x1a3   : > { %v739_v9 = vsel %vm1531_vm4, %v630_v4, 0.0  ;;  %v573_v10 = vpop.f32.mrb[8].mxu1 }
 0x1a4   : > { %v634_v11 = vmax.f32 %v573_v10, 0.0  ;;  %v575_v12 = vpop.f32.mrb[9].mxu1  ;;  %v790_v13 = vadd.f32 %v789_v5, %v788_v8  ;;  %v793_v14 = vadd.f32 %v739_v9, %v738_v7 }
 0x1a5   : > { %v464_v15 = vpop.f32.mrb[8].mxu0  ;;  %v576_v16 = vpop.f32.mrb[10].mxu1 }
 0x1a6   : > { %v743_v18 = vsel %vm1523_vm2, %v634_v11, 0.0  ;;  %v632_v19 = vmax.f32 %v464_v15, 0.0  ;;  %v637_v20 = vmax.f32 %v576_v16, 0.0  ;;  %791 = vadd.xlane.f32.xlu0 %v790_v13  ;;  %v466_v21 = vpop.f32.mrb[9].mxu0  ;;  %v578_v23 = vpop.f32.mrb[11].mxu1  ;;  %v795_v24 = vadd.f32 %v794_v17, %v793_v14 }
 0x1a7   : > { %v633_v25 = vmax.f32 %v466_v21, 0.0  ;;  %v468_v28 = vpop.f32.mrb[10].mxu0  ;;  %v799_v34 = vsel %vm778_vm5, %v743_v18, 0.0 }
 0x1a8   : > { %v741_v29 = vsel %vm1527_vm3, %v632_v19, 0.0  ;;  %v635_v30 = vmax.f32 %v468_v28, 0.0  ;;  %v470_v31 = vpop.f32.mrb[11].mxu0  ;;  %v746_v35 = vsel %vm1523_vm2, %v637_v20, 0.0 }
 0x1a9   : > { %v742_v32 = vsel %vm1531_vm4, %v633_v25, 0.0  ;;  %v636_v33 = vmax.f32 %v470_v31, 0.0  ;;  %v804_v46 = vsel %vm778_vm5, %v746_v35, 0.0 }
 0x1aa   : > { %v744_v36 = vsel %vm1527_vm3, %v635_v30, 0.0  ;;  %796 = vadd.xlane.f32.xlu0 %v795_v24  ;;  %v798_v37 = vadd.f32 %v742_v32, %v741_v29 }
 0x1ab   : > { %v745_v38 = vsel %vm1531_vm4, %v636_v33, 0.0  ;;  %v581_v39 = vpop.f32.mrb[12].mxu1 }
 0x1ac   : > { %v640_v40 = vmax.f32 %v581_v39, 0.0  ;;  %v583_v41 = vpop.f32.mrb[13].mxu1  ;;  %v800_v42 = vadd.f32 %v799_v34, %v798_v37  ;;  %v803_v43 = vadd.f32 %v745_v38, %v744_v36 }
 0x1ad   : > { %v474_v44 = vpop.f32.mrb[12].mxu0  ;;  %v584_v45 = vpop.f32.mrb[14].mxu1 }
 0x1ae   : > { %v749_v47 = vsel %vm1523_vm2, %v640_v40, 0.0  ;;  %v638_v48 = vmax.f32 %v474_v44, 0.0  ;;  %v643_v49 = vmax.f32 %v584_v45, 0.0  ;;  %801 = vadd.xlane.f32.xlu1 %v800_v42  ;;  %v476_v50 = vpop.f32.mrb[13].mxu0  ;;  %v586_v51 = vpop.f32.mrb[15].mxu1  ;;  %v805_v52 = vadd.f32 %v804_v46, %v803_v43 }
 0x1af   : > { %v639_v53 = vmax.f32 %v476_v50, 0.0  ;;  %v478_v54 = vpop.f32.mrb[14].mxu0  ;;  %v809_v62 = vsel %vm778_vm5, %v749_v47, 0.0 }
 0x1b0   : > { %v747_v55 = vsel %vm1527_vm3, %v638_v48, 0.0  ;;  %v641_v56 = vmax.f32 %v478_v54, 0.0  ;;  %806 = vadd.xlane.f32.xlu0 %v805_v52  ;;  %v480_v57 = vpop.f32.mrb[15].mxu0  ;;  %v752_v63 = vsel %vm1523_vm2, %v643_v49, 0.0 }
 0x1b1   : > { %v748_v58 = vsel %vm1531_vm4, %v639_v53, 0.0  ;;  %v642_v59 = vmax.f32 %v480_v57, 0.0  ;;  %v814_v10 = vsel %vm778_vm5, %v752_v63, 0.0 }
 0x1b2   : > { %v750_v0 = vsel %vm1527_vm3, %v641_v56, 0.0  ;;  %v808_v1 = vadd.f32 %v748_v58, %v747_v55 }
 0x1b3   : > { %v751_v2 = vsel %vm1531_vm4, %v642_v59, 0.0  ;;  %v589_v3 = vpop.f32.mrb[16].mxu1 }
 0x1b4   : > { %v646_v4 = vmax.f32 %v589_v3, 0.0  ;;  %v591_v5 = vpop.f32.mrb[17].mxu1  ;;  %v810_v6 = vadd.f32 %v809_v62, %v808_v1  ;;  %v813_v7 = vadd.f32 %v751_v2, %v750_v0 }
 0x1b5   : > { %v484_v8 = vpop.f32.mrb[16].mxu0  ;;  %v592_v9 = vpop.f32.mrb[18].mxu1 }
 0x1b6   : > { %v755_v11 = vsel %vm1523_vm2, %v646_v4, 0.0  ;;  %v644_v12 = vmax.f32 %v484_v8, 0.0  ;;  %v649_v13 = vmax.f32 %v592_v9, 0.0  ;;  %811 = vadd.xlane.f32.xlu1 %v810_v6  ;;  %v486_v14 = vpop.f32.mrb[17].mxu0  ;;  %v594_v15 = vpop.f32.mrb[19].mxu1  ;;  %v815_v16 = vadd.f32 %v814_v10, %v813_v7 }
 0x1b7   : > { %v645_v17 = vmax.f32 %v486_v14, 0.0  ;;  %v488_v18 = vpop.f32.mrb[18].mxu0  ;;  %v819_v25 = vsel %vm778_vm5, %v755_v11, 0.0 }
 0x1b8   : > { %v753_v19 = vsel %vm1527_vm3, %v644_v12, 0.0  ;;  %v647_v20 = vmax.f32 %v488_v18, 0.0  ;;  %816 = vadd.xlane.f32.xlu0 %v815_v16  ;;  %v490_v21 = vpop.f32.mrb[19].mxu0  ;;  %v758_v28 = vsel %vm1523_vm2, %v649_v13, 0.0 }
 0x1b9   : > { %v754_v23 = vsel %vm1531_vm4, %v645_v17, 0.0  ;;  %v648_v24 = vmax.f32 %v490_v21, 0.0  ;;  %v824_v39 = vsel %vm778_vm5, %v758_v28, 0.0 }
 0x1ba   : > { %v756_v29 = vsel %vm1527_vm3, %v647_v20, 0.0  ;;  %v818_v30 = vadd.f32 %v754_v23, %v753_v19 }
 0x1bb   : > { %v757_v31 = vsel %vm1531_vm4, %v648_v24, 0.0  ;;  %v597_v32 = vpop.f32.mrb[20].mxu1 }
 0x1bc   : > { %v652_v33 = vmax.f32 %v597_v32, 0.0  ;;  %v599_v34 = vpop.f32.mrb[21].mxu1  ;;  %v820_v35 = vadd.f32 %v819_v25, %v818_v30  ;;  %v823_v36 = vadd.f32 %v757_v31, %v756_v29 }
 0x1bd   : > { %v494_v37 = vpop.f32.mrb[20].mxu0  ;;  %v600_v38 = vpop.f32.mrb[22].mxu1 }
 0x1be   : > { %v761_v40 = vsel %vm1523_vm2, %v652_v33, 0.0  ;;  %v650_v41 = vmax.f32 %v494_v37, 0.0  ;;  %v655_v42 = vmax.f32 %v600_v38, 0.0  ;;  %821 = vadd.xlane.f32.xlu1 %v820_v35  ;;  %v496_v43 = vpop.f32.mrb[21].mxu0  ;;  %v602_v44 = vpop.f32.mrb[23].mxu1  ;;  %v825_v45 = vadd.f32 %v824_v39, %v823_v36 }
 0x1bf   : > { %v651_v46 = vmax.f32 %v496_v43, 0.0  ;;  %v498_v47 = vpop.f32.mrb[22].mxu0  ;;  %v829_v53 = vsel %vm778_vm5, %v761_v40, 0.0 }
 0x1c0   : > { %v759_v48 = vsel %vm1527_vm3, %v650_v41, 0.0  ;;  %v653_v49 = vmax.f32 %v498_v47, 0.0  ;;  %826 = vadd.xlane.f32.xlu0 %v825_v45  ;;  %v500_v50 = vpop.f32.mrb[23].mxu0  ;;  %v764_v54 = vsel %vm1523_vm2, %v655_v42, 0.0 }
 0x1c1   : > { %v760_v51 = vsel %vm1531_vm4, %v651_v46, 0.0  ;;  %v654_v52 = vmax.f32 %v500_v50, 0.0  ;;  %v834_v3 = vsel %vm778_vm5, %v764_v54, 0.0 }
 0x1c2   : > { %v762_v55 = vsel %vm1527_vm3, %v653_v49, 0.0  ;;  %v828_v56 = vadd.f32 %v760_v51, %v759_v48 }
 0x1c3   : > { %v763_v57 = vsel %vm1531_vm4, %v654_v52, 0.0  ;;  %v605_v58 = vpop.f32.mrb[24].mxu1 }
 0x1c4   : > { %v658_v59 = vmax.f32 %v605_v58, 0.0  ;;  %v607_v62 = vpop.f32.mrb[25].mxu1  ;;  %v830_v63 = vadd.f32 %v829_v53, %v828_v56  ;;  %v833_v0 = vadd.f32 %v763_v57, %v762_v55  ;;  %v894_v57 = vadd.s32 4294967288, %v1505_v61 }
 0x1c5   : > { %v504_v1 = vpop.f32.mrb[24].mxu0  ;;  %v608_v2 = vpop.f32.mrb[26].mxu1  ;;  %v1649_v58 = vshrl.u32 %v668_v60, 7  ;;  %v915_v62 = vadd.s32 4294967264, %v1505_v61 }
 0x1c6   : > { %v767_v4 = vsel %vm1523_vm2, %v658_v59, 0.0  ;;  %v656_v5 = vmax.f32 %v504_v1, 0.0  ;;  %v661_v6 = vmax.f32 %v608_v2, 0.0  ;;  %831 = vadd.xlane.f32.xlu1 %v830_v63  ;;  %v506_v7 = vpop.f32.mrb[25].mxu0  ;;  %v610_v8 = vpop.f32.mrb[27].mxu1  ;;  %v835_v9 = vadd.f32 %v834_v3, %v833_v0 }
 0x1c7   : > { %v657_v10 = vmax.f32 %v506_v7, 0.0  ;;  %v508_v11 = vpop.f32.mrb[26].mxu0  ;;  %v839_v17 = vsel %vm778_vm5, %v767_v4, 0.0  ;;  %v897_v63 = vsub.s32 %v894_v57, %v1649_v58  ;;  %v892_v2 = vsub.s32 %v1505_v61, %v1649_v58 }
 0x1c8   : > { %v765_v12 = vsel %vm1527_vm3, %v656_v5, 0.0  ;;  %v659_v13 = vmax.f32 %v508_v11, 0.0  ;;  %836 = vadd.xlane.f32.xlu0 %v835_v9  ;;  %v510_v14 = vpop.f32.mrb[27].mxu0  ;;  %v770_v18 = vsel %vm1523_vm2, %v661_v6, 0.0  ;;  %v904_v3 = vsub.s32 %v901_v26, %v1649_v58 }
 0x1c9   : > { %v766_v15 = vsel %vm1531_vm4, %v657_v10, 0.0  ;;  %v660_v16 = vmax.f32 %v510_v14, 0.0  ;;  %v844_v32 = vsel %vm778_vm5, %v770_v18, 0.0  ;;  %v911_v60 = vsub.s32 %v908_v27, %v1649_v58 }
 0x1ca   : > { %v768_v19 = vsel %vm1527_vm3, %v659_v13, 0.0  ;;  %v838_v20 = vadd.f32 %v766_v15, %v765_v12  ;;  %v922_v7 = vadd.s32 4294967256, %v1505_v61  ;;  %v918_v8 = vsub.s32 %v915_v62, %v1649_v58 }
 0x1cb   : > { %v769_v21 = vsel %vm1531_vm4, %v660_v16, 0.0  ;;  %v613_v23 = vpop.f32.mrb[28].mxu1  ;;  %v929_v11 = vadd.s32 4294967248, %v1505_v61  ;;  %v936_v15 = vadd.s32 4294967240, %v1505_v61  ;;  %v978_v26 = vadd.s32 4294967192, %v1505_v61 }
 0x1cc   : > { %v664_v24 = vmax.f32 %v613_v23, 0.0  ;;  %v615_v25 = vpop.f32.mrb[29].mxu1  ;;  %v840_v28 = vadd.f32 %v839_v17, %v838_v20  ;;  %v843_v29 = vadd.f32 %v769_v21, %v768_v19  ;;  %v925_v18 = vsub.s32 %v922_v7, %v1649_v58 }
 0x1cd   : > { %v514_v30 = vpop.f32.mrb[28].mxu0  ;;  %v616_v31 = vpop.f32.mrb[30].mxu1  ;;  %v932_v21 = vsub.s32 %v929_v11, %v1649_v58  ;;  %v943_v25 = vadd.s32 4294967232, %v1505_v61  ;;  %v992_v7 = vadd.s32 4294967176, %v1505_v61 }
 0x1ce   : > { %v773_v33 = vsel %vm1523_vm2, %v664_v24, 0.0  ;;  %v662_v34 = vmax.f32 %v514_v30, 0.0  ;;  %v667_v35 = vmax.f32 %v616_v31, 0.0  ;;  %841 = vadd.xlane.f32.xlu1 %v840_v28  ;;  %v516_v36 = vpop.f32.mrb[29].mxu0  ;;  %v618_v37 = vpop.f32.mrb[31].mxu1  ;;  %v845_v38 = vadd.f32 %v844_v32, %v843_v29 }
 0x1cf   : > { %v663_v39 = vmax.f32 %v516_v36, 0.0  ;;  %v518_v40 = vpop.f32.mrb[30].mxu0  ;;  %v849_v46 = vsel %vm778_vm5, %v773_v33, 0.0  ;;  %v939_v31 = vsub.s32 %v936_v15, %v1649_v58  ;;  %v950_v32 = vadd.s32 4294967224, %v1505_v61 }
 0x1d0   : > { %v771_v41 = vsel %vm1527_vm3, %v662_v34, 0.0  ;;  %v665_v42 = vmax.f32 %v518_v40, 0.0  ;;  %846 = vadd.xlane.f32.xlu0 %v845_v38  ;;  %v520_v43 = vpop.f32.mrb[31].mxu0  ;;  %v776_v47 = vsel %vm1523_vm2, %v667_v35, 0.0  ;;  %v957_v36 = vadd.s32 4294967216, %v1505_v61 }
 0x1d1   : > { %v772_v44 = vsel %vm1531_vm4, %v663_v39, 0.0  ;;  %v666_v45 = vmax.f32 %v520_v43, 0.0  ;;  %v854_v53 = vsel %vm778_vm5, %v776_v47, 0.0  ;;  %v946_v39 = vsub.s32 %v943_v25, %v1649_v58 }
 0x1d2   : > { %v774_v48 = vsel %vm1527_vm3, %v665_v42, 0.0  ;;  %v848_v49 = vadd.f32 %v772_v44, %v771_v41  ;;  %v953_v43 = vsub.s32 %v950_v32, %v1649_v58  ;;  %v964_v44 = vadd.s32 4294967208, %v1505_v61 }
 0x1d3   : > { %v775_v50 = vsel %vm1531_vm4, %v666_v45, 0.0  ;;  %vm983_vm2 = vcmask 917312   ;;  %vm990_vm3 = vcmask 982912   ;;  %vm997_vm4 = vcmask 1048512  }
 0x1d4   : > { %v853_v51 = vadd.f32 %v775_v50, %v774_v48  ;;  %v850_v52 = vadd.f32 %v849_v46, %v848_v49  ;;  %v960_v48 = vsub.s32 %v957_v36, %v1649_v58 }
 0x1d6   : > { %851 = vadd.xlane.f32.xlu1 %v850_v52  ;;  %v855_v54 = vadd.f32 %v854_v53, %v853_v51  ;;  %v971_v53 = vadd.s32 4294967200, %v1505_v61 }
 0x1d8   : > { %856 = vadd.xlane.f32.xlu0 %v855_v54  ;;  %v967_v54 = vsub.s32 %v964_v44, %v1649_v58  ;;  %v974_v62 = vsub.s32 %v971_v53, %v1649_v58 }
 0x22b   : > { %v782_v55 = vpop.xlane.xlu0 %781 }
 0x22c   : > { %v858_v5 = vmul.f32 0.00390625, %v782_v55 }
 0x22d   : > { %v787_v22 = vpop.xlane.xlu1 %786 }
 0x22e   : > { %v859_v0 = vmul.f32 0.00390625, %v787_v22  ;;  %v893_v16 = vrot.slane %v858_v5, %v892_v2 }
 0x230   : > { %v898_v12 = vrot.slane %v859_v0, %v897_v63 }
 0x232   : > { %v900_v28 = vsel %vm899_vm6, %v898_v12, %v893_v16 }
 0x233   : > { %v792_v56 = vpop.xlane.xlu0 %791 }
 0x234   : > { %v860_v4 = vmul.f32 0.00390625, %v792_v56 }
 0x236   : > { %v905_v14 = vrot.slane %v860_v4, %v904_v3  ;;  %v981_v4 = vsub.s32 %v978_v26, %v1649_v58 }
 0x237   : > { %v797_v59 = vpop.xlane.xlu0 %796 }
 0x238   : > { %v861_v6 = vmul.f32 0.00390625, %v797_v59  ;;  %v907_v30 = vsel %vm906_vm7, %v905_v14, %v900_v28  ;;  %v995_v14 = vsub.s32 %v992_v7, %v1649_v58 }
 0x23a   : > { %v912_v17 = vrot.slane %v861_v6, %v911_v60 }
 0x23b   : > { %v802_v1 = vpop.xlane.xlu1 %801 }
 0x23c   : > { %v862_v9 = vmul.f32 0.00390625, %v802_v1  ;;  %v914_v33 = vsel %vm913_vm8, %v912_v17, %v907_v30  ;;  %v985_v1 = vadd.s32 4294967184, %v1505_v61 }
 0x23d   : > { %v807_v10 = vpop.xlane.xlu0 %806 }
 0x23e   : > { %v863_v19 = vmul.f32 0.00390625, %v807_v10  ;;  %v919_v20 = vrot.slane %v862_v9, %v918_v8  ;;  %v988_v8 = vsub.s32 %v985_v1, %v1649_v58 }
 0x240   : > { %v926_v34 = vrot.slane %v863_v19, %v925_v18  ;;  %v921_v37 = vsel %vm920_vm9, %v919_v20, %v914_v33 }
 0x242   : > { %v928_v45 = vsel %vm927_vm10, %v926_v34, %v921_v37 }
 0x243   : > { %v812_v13 = vpop.xlane.xlu1 %811 }
 0x244   : > { %v864_v23 = vmul.f32 0.00390625, %v812_v13 }
 0x245   : > { %v817_v24 = vpop.xlane.xlu0 %816 }
 0x246   : > { %v865_v35 = vmul.f32 0.00390625, %v817_v24  ;;  %v933_v38 = vrot.slane %v864_v23, %v932_v21 }
 0x248   : > { %v940_v46 = vrot.slane %v865_v35, %v939_v31  ;;  %v935_v49 = vsel %vm934_vm11, %v933_v38, %v928_v45 }
 0x24a   : > { %v942_v55 = vsel %vm941_vm12, %v940_v46, %v935_v49 }
 0x24b   : > { %v822_v29 = vpop.xlane.xlu1 %821 }
 0x24c   : > { %v866_v40 = vmul.f32 0.00390625, %v822_v29 }
 0x24d   : > { %v827_v41 = vpop.xlane.xlu0 %826 }
 0x24e   : > { %v867_v47 = vmul.f32 0.00390625, %v827_v41  ;;  %v947_v50 = vrot.slane %v866_v40, %v946_v39 }
 0x250   : > { %v954_v56 = vrot.slane %v867_v47, %v953_v43  ;;  %v949_v27 = vsel %vm948_vm13, %v947_v50, %v942_v55 }
 0x252   : > { %v956_v2 = vsel %vm955_vm14, %v954_v56, %v949_v27 }
 0x253   : > { %v832_v42 = vpop.xlane.xlu1 %831 }
 0x254   : > { %v868_v51 = vmul.f32 0.00390625, %v832_v42 }
 0x255   : > { %v837_v52 = vpop.xlane.xlu0 %836 }
 0x256   : > { %v869_v57 = vmul.f32 0.00390625, %v837_v52  ;;  %v961_v59 = vrot.slane %v868_v51, %v960_v48 }
 0x258   : > { %v968_v3 = vrot.slane %v869_v57, %v967_v54  ;;  %v963_v60 = vsel %vm962_vm15, %v961_v59, %v956_v2 }
 0x25a   : > { %v970_v9 = vsel %vm969_vm0, %v968_v3, %v963_v60 }
 0x25b   : > { %v842_v22 = vpop.xlane.xlu1 %841 }
 0x25c   : > { %v870_v63 = vmul.f32 0.00390625, %v842_v22 }
 0x25d   : > { %v847_v0 = vpop.xlane.xlu0 %846 }
 0x25e   : > { %v871_v5 = vmul.f32 0.00390625, %v847_v0  ;;  %v975_v6 = vrot.slane %v870_v63, %v974_v62 }
 0x260   : > { %v982_v10 = vrot.slane %v871_v5, %v981_v4  ;;  %v977_v12 = vsel %vm976_vm1, %v975_v6, %v970_v9 }
 0x262   : > { %v984_v61 = vsel %vm983_vm2, %v982_v10, %v977_v12 }
 0x263   : > { %v852_v11 = vpop.xlane.xlu1 %851 }
 0x264   : > { %v872_v13 = vmul.f32 0.00390625, %v852_v11 }
 0x265   : > { %v857_v15 = vpop.xlane.xlu0 %856 }
 0x266   : > { %v989_v16 = vrot.slane %v872_v13, %v988_v8  ;;  %v873_v17 = vmul.f32 0.00390625, %v857_v15 }
 0x268   : > { %v991_v18 = vsel %vm990_vm3, %v989_v16, %v984_v61  ;;  %v996_v19 = vrot.slane %v873_v17, %v995_v14 }
 0x26a   : > { %v998_v58 = vsel %vm997_vm4, %v996_v19, %v991_v18 }
 0x26b   : > { %1000 = vst [vmem:[%s167_s7] sm:$0x1] %v998_v58 }
 0x26c   : > { %1273 = shalt.err (!%p1270_p7)
}
 0x26d   : > { %s1274_s28 = scalar_lea.hbm %s1692_s12, 16  ;;  %s1278_s3 = scalar_lea.hbm %s1747_s2, 128 }
 0x26e   : > { %p1275_p9 = scmp.ne.s32.totalorder %s1692_s12, %s1274_s28  ;;  %p1279_p12 = scmp.lt.u32.totalorder %s1692_s12, %s1747_s2 }
 0x26f   : > { %p1280_p13 = scmp.lt.u32.totalorder %s1278_s3, %s1274_s28  ;;  %p1282_p1 = scmp.lt.u32.totalorder %s1274_s28, %s1692_s12 }
 0x270   : > { %p1276_p10 = pnand %p1275_p9, %p1432_p3 }
 0x271   : > { %p1281_p0 = por %p1280_p13, %p1279_p12 }
 0x272   : > { %p1277_p11 = pneg %p1276_p10 }
 0x273   : > { %p1283_p2 = por %p1282_p1, %p1281_p0 }
 0x275   : > { %p1284_p4 = pnand %p1283_p2, %p1277_p11 }
 0x277   : > { %1287 = shalt.err (!%p1284_p4)
}
 0x278   : > { %1152 = dma.vmem_to_hbm [thread:$0]  (%p1432_p3), %s1694_s13, 16, %s1692_s12, %s1002_s18  }
 0x279 PF: > { %p1158_p5 = scmp.ge.s32.totalorder %s1354_s16, 2  ;;  %s1028_s6 = sand.u32 1, %s1326_s9  }
 0x27a   : > { %s1029_s7 = scalar_lea.sflag [#allocation3], %s1028_s6 }
 0x27b   : > { %p1155_p6 = pnand %p1158_p5, %p1441_p8 }
 0x27d   : > { %1321 = dma.done.wait (!%p1155_p6), %s1029_s7, 16  }
 0x27e   : > { %1323 = vsyncadd (!%p1155_p6), %s1029_s7, 4294967280  ;;  %s15_s16 = sadd.s32 1, %s1354_s16   ;;  %s1756_s9 = smov %s1330_s10 }
 0x27f   : > { %p12_p7 = scmp.ge.s32.totalorder %s15_s16, 10   ;;  %s1757_s10 = smov %s1334_s11 }
 0x280   : > { %s1758_s11 = smov %s1450_s27  ;;  %s1759_s12 = smov %s1346_s14 }
 0x281   : > { %s1760_s13 = smov %s1350_s15  ;;  %s1761_s14 = smov %s1764_s19 }
 0x282   : > { %s1762_s15 = smov %s1768_s20  ;;  %14 = sbr.rel (!%p12_p7) target bundleno = 5 (0x5), region = 66 }
 0x289   :  { %1033 = vsyncpa [#allocation3], 1 }
 0x28a   :  { %1035 = vsyncpa [#allocation3 + $0x1], 1 }

</bundles_post_ra>
